<compile_context>
chip_gen: v6e
topology: v6e:2x2x1
jax: 0.10.0
libtpu: 0.0.40
codegen_flags: <defaults>
</compile_context>

<pallas_src>
import functools

import jax
import jax.numpy as jnp
from jax.experimental import pallas as pl
from jax.experimental.pallas import tpu as pltpu

_EPS = 1e-8
_HIGHEST = jax.lax.Precision.HIGHEST


def _stats_select_kernel(*refs, num_branches):
    # refs = (branch_0, ..., branch_{K-1}, wf_ref, bf_ref, out_ref)
    # branch_k : (TB, C, T)      native dtype
    # wf_ref   : (4C, K*C)       folded W1@W2 (stat-major rows, branch-major cols)
    # bf_ref   : (K, C)          folded b1@W2 + b2
    # out_ref  : (TB, C, T)
    K = num_branches
    branch_refs = refs[:K]
    wf_ref, bf_ref, out_ref = refs[K], refs[K + 1], refs[K + 2]

    TB, C, T = branch_refs[0].shape
    R = TB * C
    inv_T = 1.0 / T

    # ---- branch sum, accumulated in f32 (branches stay native otherwise) ----
    x3 = branch_refs[0][...].astype(jnp.float32)
    for k in range(1, K):
        x3 = x3 + branch_refs[k][...].astype(jnp.float32)            # (TB, C, T)

    # ---- HighOrderStatsPool over time; row sums on the MXU, not the XLU ----
    # (TB, C, T) -> (TB*C, T): layout preserving when C % 8 == 0.
    x = x3.reshape(R, T)
    ones_red = jnp.ones((T, 8), jnp.float32)                          # reduction RHS

    def tsum(a):                                                      # (R, T) -> (R, 1)
        return jnp.dot(a, ones_red, preferred_element_type=jnp.float32)[:, :1]

    mean = tsum(x) * inv_T                                            # (R, 1)
    xc = x - mean                    # two-pass centering: keeps skew/kurt well conditioned
    x2 = xc * xc                     # reuse centered powers
    m2 = tsum(x2) * inv_T
    m3 = tsum(x2 * xc) * inv_T
    m4 = tsum(x2 * x2) * inv_T

    std = jnp.sqrt(m2 + _EPS)                                         # exact (tiny tensor)
    std2 = std * std
    skew = m3 / (std2 * std)
    kurt = m4 / (std2 * std2)

    # ---- one fused (TB, 4C) @ (4C, K*C) matmul for linear1 + linear2 ----
    def to_bc(v):                                                     # (R, 1) -> (TB, C)
        return v.reshape(TB, C)

    stats = jnp.concatenate(
        [to_bc(mean), to_bc(std), to_bc(skew), to_bc(kurt)], axis=-1)  # (TB, 4C)
    logits_flat = jnp.dot(stats, wf_ref[...],
                          preferred_element_type=jnp.float32)          # (TB, K*C)
    bf = bf_ref[...].astype(jnp.float32)                               # (K, C)

    # ---- softmax over the branch axis (exact reciprocal: weights sum to 1) ----
    # TODO(synk): keep C a multiple of 128 in production so these per-branch
    # lane slices start on vreg boundaries.
    logits = [logits_flat[:, k * C:(k + 1) * C] + bf[k] for k in range(K)]
    m = logits[0]
    for k in range(1, K):
        m = jnp.maximum(m, logits[k])
    exps = [jnp.exp(l - m) for l in logits]                            # K x (TB, C)
    denom = exps[0]
    for k in range(1, K):
        denom = denom + exps[k]
    inv_denom = 1.0 / denom                                            # exact

    # ---- weighted recombination, multiplied/accumulated in the branch dtype ----
    bdt = branch_refs[0].dtype
    acc = None
    for k in range(K):
        w_k = (exps[k] * inv_denom).astype(bdt)[..., None]             # (TB, C, 1)
        contrib = branch_refs[k][...] * w_k
        acc = contrib if acc is None else acc + contrib
    out_ref[...] = acc.astype(out_ref.dtype)


def _vmem_limit_bytes():
    """Scoped-VMEM limit: half the physical VMEM (v5e/v6e 128 MiB -> 64 MiB,
    v7x 64 MiB -> 32 MiB), capped at 96 MiB."""
    try:
        cap = pltpu.get_tpu_info().vmem_capacity_bytes
    except Exception:
        cap = 128 * 1024 * 1024
    return int(min(96 * 1024 * 1024, cap // 2))


def _choose_tb(B, K, C, T, itemsize, budget_bytes, min_grid_steps=4):
    """Largest divisor of B that fits the VMEM budget AND keeps >= min_grid_steps
    grid steps (double buffering + v7x two-TensorCore sharding)."""
    # double-buffered K input blocks + output block (native dtype)
    # + ~6 f32-equivalent temporaries of shape (C, T) per batch row.
    per_row = 2 * (K + 1) * C * T * itemsize + 6 * C * T * 4
    tb_vmem = max(1, min(B, budget_bytes // max(per_row, 1)))
    tb_grid = max(1, B // min(B, min_grid_steps))
    tb = max(1, min(tb_vmem, tb_grid))
    while B % tb:
        tb -= 1
    return tb


def fold_stats_select_params(w1, b1, w2, b2, dtype=jnp.float32):
    """Fold linear1 (Identity act) into the K linear2 heads (pure algebra).

    Call ONCE per weight update, outside the per-forward path:
      logits[b,k,c] = stats[b,:] @ (W1 @ W2[k]) + (b1 @ W2[k] + b2[k])
    Returns wf (4C, K*C) and bf (K, C); pass dtype=bf16 for bf16 models to
    halve the weight DMA / VMEM footprint.
    """
    K, R, C = w2.shape
    assert w1.shape == (4 * C, R) and b1.shape == (R,) and b2.shape == (K, C)
    w1f = w1.astype(jnp.float32)
    w2f = w2.astype(jnp.float32)
    wf = jnp.einsum("fr,krc->fkc", w1f, w2f, precision=_HIGHEST)
    wf = wf.reshape(4 * C, K * C)                                      # stat-major rows
    bf = jnp.einsum("r,krc->kc", b1.astype(jnp.float32), w2f,
                    precision=_HIGHEST) + b2.astype(jnp.float32)       # (K, C)
    return wf.astype(dtype), bf.astype(dtype)


def stats_select(branch_inputs, wf, bf, *, tb=None):
    """branch_inputs: list of K (B, C, T) arrays; wf/bf from fold_stats_select_params."""
    K = len(branch_inputs)
    B, C, T = branch_inputs[0].shape
    assert wf.shape == (4 * C, K * C) and bf.shape == (K, C)
    # TODO(synk): for production keep T a multiple of 128 (lane-dense stores)
    # and C a multiple of 8 (free (TB,C,T)->(TB*C,T) view) / 128 (aligned
    # per-branch logit slices).
    # TODO(synk): for very long T on v7x, add an 'arbitrary' T grid axis that
    # accumulates the moment sums in VMEM scratch instead of growing the block.

    vmem_limit = _vmem_limit_bytes()
    # Weight blocks are constant across the grid but still double-buffered by
    # the pipeline: charge them against the budget before sizing tb.
    # TODO(synk): single-buffer them (pl.Buffered(1) / manual one-shot DMA) at
    # production C to reclaim ~half of this.
    weight_bytes = 2 * (wf.size * wf.dtype.itemsize + bf.size * bf.dtype.itemsize)
    budget = int(0.9 * vmem_limit) - weight_bytes

    if tb is None:
        tb = _choose_tb(B, K, C, T, branch_inputs[0].dtype.itemsize, budget)
    assert B % tb == 0, "block size must divide the batch"
    grid = (B // tb,)

    branch_spec = pl.BlockSpec((tb, C, T), lambda i: (i, 0, 0))
    in_specs = [branch_spec] * K + [
        pl.BlockSpec((4 * C, K * C), lambda i: (0, 0)),
        pl.BlockSpec((K, C), lambda i: (0, 0)),
    ]
    out_spec = pl.BlockSpec((tb, C, T), lambda i: (i, 0, 0))

    kernel = functools.partial(_stats_select_kernel, num_branches=K)
    return pl.pallas_call(
        kernel,
        out_shape=jax.ShapeDtypeStruct((B, C, T), branch_inputs[0].dtype),
        grid=grid,
        in_specs=in_specs,
        out_specs=out_spec,
        compiler_params=pltpu.CompilerParams(
            dimension_semantics=("parallel",),
            vmem_limit_bytes=vmem_limit,
        ),
    )(*branch_inputs, wf, bf)


def _reference(branch_inputs, w1, b1, w2, b2):
    """Pure-JAX reference (f32-accurate matmuls) for correctness checking."""
    f = jnp.stack(branch_inputs, axis=1).astype(jnp.float32)
    x = jnp.sum(f, axis=1)
    mean = jnp.mean(x, axis=-1)
    xc = x - mean[..., None]
    var = jnp.mean(xc * xc, axis=-1)
    std = jnp.sqrt(var + _EPS)
    skew = jnp.mean(xc ** 3, axis=-1) / std ** 3
    kurt = jnp.mean(xc ** 4, axis=-1) / std ** 4
    stats = jnp.concatenate([mean, std, skew, kurt], axis=-1)
    h = jnp.dot(stats, w1.astype(jnp.float32), precision=_HIGHEST) + b1
    logits = jnp.einsum("br,krc->bkc", h, w2.astype(jnp.float32),
                        precision=_HIGHEST) + b2[None]
    s = jax.nn.softmax(logits, axis=1)
    return jnp.sum(f * s[..., None], axis=1)


if __name__ == "__main__":
    # Small shapes consistent with the module: (B, C, T) features, K branches.
    B, C, T = 4, 16, 128         # batch, in_out_channels, time (lane-dense T)
    R = 8                        # reduction_channels
    K = 3                        # num_branches

    key = jax.random.PRNGKey(0)
    keys = jax.random.split(key, 7)

    # branch inputs
    x_a = jax.random.normal(keys[0], (B, C, T), dtype=jnp.float32)
    x_b = jax.random.normal(keys[1], (B, C, T), dtype=jnp.float32)
    x_c = jax.random.normal(keys[2], (B, C, T), dtype=jnp.float32)

    # deterministic synthetic parameters (shapes from __init__)
    w1 = jax.random.normal(keys[3], (4 * C, R), dtype=jnp.float32) * 0.1   # linear1
    b1 = jax.random.normal(keys[4], (R,), dtype=jnp.float32) * 0.1
    w2 = jax.random.normal(keys[5], (K, R, C), dtype=jnp.float32) * 0.1    # linear2 x K
    b2 = jax.random.normal(keys[6], (K, C), dtype=jnp.float32) * 0.1

    # Fold the two Identity-activation linears ONCE, off the per-call path.
    wf, bf = fold_stats_select_params(w1, b1, w2, b2, dtype=x_a.dtype)

    out = stats_select([x_a, x_b, x_c], wf, bf)
    out = jax.block_until_ready(out)

    ref = _reference([x_a, x_b, x_c], w1, b1, w2, b2)
    assert out.shape == (B, C, T)
    ok = bool(jnp.allclose(out, ref, atol=2e-3, rtol=2e-3))
    assert ok, (
        f"mismatch vs reference, max abs err={float(jnp.max(jnp.abs(out - ref)))}")

    print("KERNEL_OK")
</pallas_src>

<mosaic_0001>
module attributes {stable_mosaic.version = 11 : i64} {
  func.func @_stats_select_kernel(%arg0: i32, %arg1: memref<1x16x128xf32, #tpu.memory_space<vmem>>, %arg2: memref<1x16x128xf32, #tpu.memory_space<vmem>>, %arg3: memref<1x16x128xf32, #tpu.memory_space<vmem>>, %arg4: memref<64x48xf32, #tpu.memory_space<vmem>>, %arg5: memref<3x16xf32, #tpu.memory_space<vmem>>, %arg6: memref<1x16x128xf32, #tpu.memory_space<vmem>>) attributes {dimension_semantics = [#tpu.dimension_semantics<parallel>], iteration_bounds = array<i64: 4>, scalar_prefetch = 0 : i64, scratch_operands = 0 : i64, tpu.core_type = #tpu.core_type<tc>, window_params = [{transform_indices = @transform_0, window_bounds = array<i64: 1, 16, 128>}, {transform_indices = @transform_1, window_bounds = array<i64: 1, 16, 128>}, {transform_indices = @transform_2, window_bounds = array<i64: 1, 16, 128>}, {pipeline_mode = #tpu.pipeline_mode<synchronous>, transform_indices = @transform_3, window_bounds = array<i64: 64, 48>}, {pipeline_mode = #tpu.pipeline_mode<synchronous>, transform_indices = @transform_4, window_bounds = array<i64: 3, 16>}, {transform_indices = @transform_5, window_bounds = array<i64: 1, 16, 128>}]} {
    %c0 = arith.constant 0 : index
    %c0_0 = arith.constant 0 : index
    %c0_1 = arith.constant 0 : index
    %0 = vector.load %arg1[%c0, %c0_0, %c0_1] : memref<1x16x128xf32, #tpu.memory_space<vmem>>, vector<1x16x128xf32>
    %c0_2 = arith.constant 0 : index
    %c0_3 = arith.constant 0 : index
    %c0_4 = arith.constant 0 : index
    %1 = vector.load %arg2[%c0_2, %c0_3, %c0_4] : memref<1x16x128xf32, #tpu.memory_space<vmem>>, vector<1x16x128xf32>
    %2 = arith.addf %0, %1 : vector<1x16x128xf32>
    %c0_5 = arith.constant 0 : index
    %c0_6 = arith.constant 0 : index
    %c0_7 = arith.constant 0 : index
    %3 = vector.load %arg3[%c0_5, %c0_6, %c0_7] : memref<1x16x128xf32, #tpu.memory_space<vmem>>, vector<1x16x128xf32>
    %4 = arith.addf %2, %3 : vector<1x16x128xf32>
    %5 = vector.shape_cast %4 : vector<1x16x128xf32> to vector<16x128xf32>
    %cst = arith.constant 1.000000e+00 : f32
    %6 = vector.broadcast %cst : f32 to vector<128x8xf32>
    %cst_8 = arith.constant dense<0.000000e+00> : vector<16x8xf32>
    %7 = tpu.matmul %5, %6, %cst_8 {dimension_numbers = #tpu.dot_dimension_numbers<[1], [0], [0], [1], [0, 0, 1, 1], [], []>} : vector<16x128xf32>, vector<128x8xf32>, vector<16x8xf32> -> vector<16x8xf32>
    %8 = vector.extract_strided_slice %7 {offsets = [0, 0], sizes = [16, 1], strides = [1, 1]} : vector<16x8xf32> to vector<16x1xf32>
    %cst_9 = arith.constant 7.812500e-03 : f32
    %9 = vector.broadcast %cst_9 : f32 to vector<16x1xf32>
    %10 = arith.mulf %8, %9 : vector<16x1xf32>
    %11 = vector.broadcast %10 : vector<16x1xf32> to vector<16x128xf32>
    %12 = arith.subf %5, %11 : vector<16x128xf32>
    %13 = arith.mulf %12, %12 : vector<16x128xf32>
    %cst_10 = arith.constant dense<0.000000e+00> : vector<16x8xf32>
    %14 = tpu.matmul %13, %6, %cst_10 {dimension_numbers = #tpu.dot_dimension_numbers<[1], [0], [0], [1], [0, 0, 1, 1], [], []>} : vector<16x128xf32>, vector<128x8xf32>, vector<16x8xf32> -> vector<16x8xf32>
    %15 = vector.extract_strided_slice %14 {offsets = [0, 0], sizes = [16, 1], strides = [1, 1]} : vector<16x8xf32> to vector<16x1xf32>
    %cst_11 = arith.constant 7.812500e-03 : f32
    %16 = vector.broadcast %cst_11 : f32 to vector<16x1xf32>
    %17 = arith.mulf %15, %16 : vector<16x1xf32>
    %18 = arith.mulf %13, %12 : vector<16x128xf32>
    %cst_12 = arith.constant dense<0.000000e+00> : vector<16x8xf32>
    %19 = tpu.matmul %18, %6, %cst_12 {dimension_numbers = #tpu.dot_dimension_numbers<[1], [0], [0], [1], [0, 0, 1, 1], [], []>} : vector<16x128xf32>, vector<128x8xf32>, vector<16x8xf32> -> vector<16x8xf32>
    %20 = vector.extract_strided_slice %19 {offsets = [0, 0], sizes = [16, 1], strides = [1, 1]} : vector<16x8xf32> to vector<16x1xf32>
    %cst_13 = arith.constant 7.812500e-03 : f32
    %21 = vector.broadcast %cst_13 : f32 to vector<16x1xf32>
    %22 = arith.mulf %20, %21 : vector<16x1xf32>
    %23 = arith.mulf %13, %13 : vector<16x128xf32>
    %cst_14 = arith.constant dense<0.000000e+00> : vector<16x8xf32>
    %24 = tpu.matmul %23, %6, %cst_14 {dimension_numbers = #tpu.dot_dimension_numbers<[1], [0], [0], [1], [0, 0, 1, 1], [], []>} : vector<16x128xf32>, vector<128x8xf32>, vector<16x8xf32> -> vector<16x8xf32>
    %25 = vector.extract_strided_slice %24 {offsets = [0, 0], sizes = [16, 1], strides = [1, 1]} : vector<16x8xf32> to vector<16x1xf32>
    %cst_15 = arith.constant 7.812500e-03 : f32
    %26 = vector.broadcast %cst_15 : f32 to vector<16x1xf32>
    %27 = arith.mulf %25, %26 : vector<16x1xf32>
    %cst_16 = arith.constant 9.99999993E-9 : f32
    %28 = vector.broadcast %cst_16 : f32 to vector<16x1xf32>
    %29 = arith.addf %17, %28 : vector<16x1xf32>
    %30 = math.sqrt %29 : vector<16x1xf32>
    %31 = arith.mulf %30, %30 : vector<16x1xf32>
    %32 = arith.mulf %31, %30 : vector<16x1xf32>
    %33 = arith.divf %22, %32 : vector<16x1xf32>
    %34 = arith.mulf %31, %31 : vector<16x1xf32>
    %35 = arith.divf %27, %34 : vector<16x1xf32>
    %36 = vector.shape_cast %10 : vector<16x1xf32> to vector<1x16xf32>
    %37 = vector.shape_cast %30 : vector<16x1xf32> to vector<1x16xf32>
    %38 = vector.shape_cast %33 : vector<16x1xf32> to vector<1x16xf32>
    %39 = vector.shape_cast %35 : vector<16x1xf32> to vector<1x16xf32>
    %40 = tpu.concatenate %36, %37, %38, %39 in 1 : vector<1x16xf32>, vector<1x16xf32>, vector<1x16xf32>, vector<1x16xf32> -> vector<1x64xf32>
    %c0_17 = arith.constant 0 : index
    %c0_18 = arith.constant 0 : index
    %41 = vector.load %arg4[%c0_17, %c0_18] : memref<64x48xf32, #tpu.memory_space<vmem>>, vector<64x48xf32>
    %cst_19 = arith.constant dense<0.000000e+00> : vector<1x48xf32>
    %42 = tpu.matmul %40, %41, %cst_19 {dimension_numbers = #tpu.dot_dimension_numbers<[1], [0], [0], [1], [0, 0, 1, 1], [], []>} : vector<1x64xf32>, vector<64x48xf32>, vector<1x48xf32> -> vector<1x48xf32>
    %c0_20 = arith.constant 0 : index
    %c0_21 = arith.constant 0 : index
    %43 = vector.load %arg5[%c0_20, %c0_21] : memref<3x16xf32, #tpu.memory_space<vmem>>, vector<3x16xf32>
    %44 = vector.extract_strided_slice %42 {offsets = [0, 0], sizes = [1, 16], strides = [1, 1]} : vector<1x48xf32> to vector<1x16xf32>
    %45 = vector.extract_strided_slice %43 {offsets = [0, 0], sizes = [1, 16], strides = [1, 1]} : vector<3x16xf32> to vector<1x16xf32>
    %46 = vector.shape_cast %45 : vector<1x16xf32> to vector<16xf32>
    %47 = vector.shape_cast %46 : vector<16xf32> to vector<1x16xf32>
    %48 = arith.addf %44, %47 : vector<1x16xf32>
    %49 = vector.extract_strided_slice %42 {offsets = [0, 16], sizes = [1, 16], strides = [1, 1]} : vector<1x48xf32> to vector<1x16xf32>
    %50 = vector.extract_strided_slice %43 {offsets = [1, 0], sizes = [1, 16], strides = [1, 1]} : vector<3x16xf32> to vector<1x16xf32>
    %51 = vector.shape_cast %50 : vector<1x16xf32> to vector<16xf32>
    %52 = vector.shape_cast %51 : vector<16xf32> to vector<1x16xf32>
    %53 = arith.addf %49, %52 : vector<1x16xf32>
    %54 = vector.extract_strided_slice %42 {offsets = [0, 32], sizes = [1, 16], strides = [1, 1]} : vector<1x48xf32> to vector<1x16xf32>
    %55 = vector.extract_strided_slice %43 {offsets = [2, 0], sizes = [1, 16], strides = [1, 1]} : vector<3x16xf32> to vector<1x16xf32>
    %56 = vector.shape_cast %55 : vector<1x16xf32> to vector<16xf32>
    %57 = vector.shape_cast %56 : vector<16xf32> to vector<1x16xf32>
    %58 = arith.addf %54, %57 : vector<1x16xf32>
    %59 = arith.maximumf %48, %53 : vector<1x16xf32>
    %60 = arith.maximumf %59, %58 : vector<1x16xf32>
    %61 = arith.subf %48, %60 : vector<1x16xf32>
    %62 = math.exp %61 : vector<1x16xf32>
    %63 = arith.subf %53, %60 : vector<1x16xf32>
    %64 = math.exp %63 : vector<1x16xf32>
    %65 = arith.subf %58, %60 : vector<1x16xf32>
    %66 = math.exp %65 : vector<1x16xf32>
    %67 = arith.addf %62, %64 : vector<1x16xf32>
    %68 = arith.addf %67, %66 : vector<1x16xf32>
    %cst_22 = arith.constant 1.000000e+00 : f32
    %69 = vector.broadcast %cst_22 : f32 to vector<1x16xf32>
    %70 = arith.divf %69, %68 : vector<1x16xf32>
    %71 = arith.mulf %62, %70 : vector<1x16xf32>
    %72 = vector.shape_cast %71 : vector<1x16xf32> to vector<1x16x1xf32>
    %c0_23 = arith.constant 0 : index
    %c0_24 = arith.constant 0 : index
    %c0_25 = arith.constant 0 : index
    %73 = vector.load %arg1[%c0_23, %c0_24, %c0_25] : memref<1x16x128xf32, #tpu.memory_space<vmem>>, vector<1x16x128xf32>
    %74 = vector.broadcast %72 : vector<1x16x1xf32> to vector<1x16x128xf32>
    %75 = arith.mulf %73, %74 : vector<1x16x128xf32>
    %76 = arith.mulf %64, %70 : vector<1x16xf32>
    %77 = vector.shape_cast %76 : vector<1x16xf32> to vector<1x16x1xf32>
    %c0_26 = arith.constant 0 : index
    %c0_27 = arith.constant 0 : index
    %c0_28 = arith.constant 0 : index
    %78 = vector.load %arg2[%c0_26, %c0_27, %c0_28] : memref<1x16x128xf32, #tpu.memory_space<vmem>>, vector<1x16x128xf32>
    %79 = vector.broadcast %77 : vector<1x16x1xf32> to vector<1x16x128xf32>
    %80 = arith.mulf %78, %79 : vector<1x16x128xf32>
    %81 = arith.addf %75, %80 : vector<1x16x128xf32>
    %82 = arith.mulf %66, %70 : vector<1x16xf32>
    %83 = vector.shape_cast %82 : vector<1x16xf32> to vector<1x16x1xf32>
    %c0_29 = arith.constant 0 : index
    %c0_30 = arith.constant 0 : index
    %c0_31 = arith.constant 0 : index
    %84 = vector.load %arg3[%c0_29, %c0_30, %c0_31] : memref<1x16x128xf32, #tpu.memory_space<vmem>>, vector<1x16x128xf32>
    %85 = vector.broadcast %83 : vector<1x16x1xf32> to vector<1x16x128xf32>
    %86 = arith.mulf %84, %85 : vector<1x16x128xf32>
    %87 = arith.addf %81, %86 : vector<1x16x128xf32>
    %c0_32 = arith.constant 0 : index
    %c0_33 = arith.constant 0 : index
    %c0_34 = arith.constant 0 : index
    %88 = vector.load %arg6[%c0_32, %c0_33, %c0_34] : memref<1x16x128xf32, #tpu.memory_space<vmem>>, vector<1x16x128xf32>
    tpu.vector_store %arg6[%c0_32, %c0_33, %c0_34], %87 {strides = array<i32>} : memref<1x16x128xf32, #tpu.memory_space<vmem>>, vector<1x16x128xf32>,
    return
  }
  func.func @transform_0(%arg0: i32) -> (i32, i32, i32) {
    %c0_i32 = arith.constant 0 : i32
    %c0_i32_0 = arith.constant 0 : i32
    %c0_i32_1 = arith.constant 0 : i32
    return %arg0, %c0_i32, %c0_i32_0 : i32, i32, i32
  }
  func.func @transform_1(%arg0: i32) -> (i32, i32, i32) {
    %c0_i32 = arith.constant 0 : i32
    %c0_i32_0 = arith.constant 0 : i32
    %c0_i32_1 = arith.constant 0 : i32
    return %arg0, %c0_i32, %c0_i32_0 : i32, i32, i32
  }
  func.func @transform_2(%arg0: i32) -> (i32, i32, i32) {
    %c0_i32 = arith.constant 0 : i32
    %c0_i32_0 = arith.constant 0 : i32
    %c0_i32_1 = arith.constant 0 : i32
    return %arg0, %c0_i32, %c0_i32_0 : i32, i32, i32
  }
  func.func @transform_3(%arg0: i32) -> (i32, i32) {
    %c0_i32 = arith.constant 0 : i32
    %c0_i32_0 = arith.constant 0 : i32
    %c0_i32_1 = arith.constant 0 : i32
    return %c0_i32, %c0_i32_0 : i32, i32
  }
  func.func @transform_4(%arg0: i32) -> (i32, i32) {
    %c0_i32 = arith.constant 0 : i32
    %c0_i32_0 = arith.constant 0 : i32
    %c0_i32_1 = arith.constant 0 : i32
    return %c0_i32, %c0_i32_0 : i32, i32
  }
  func.func @transform_5(%arg0: i32) -> (i32, i32, i32) {
    %c0_i32 = arith.constant 0 : i32
    %c0_i32_0 = arith.constant 0 : i32
    %c0_i32_1 = arith.constant 0 : i32
    return %arg0, %c0_i32, %c0_i32_0 : i32, i32, i32
  }
}

</mosaic_0001>

<bundles_post_ra>
// kernel: tpu_custom_call.1
= control target key start
LH: loop header
LB: loop body
LE: loop exit
PB: predicated region body
PF: predicated region fallthrough
CT: control target
= control target key end

     0   :  { %10 = vsyncpa [#allocation3], 0  ;;  %s2036_s0 = inlined_call_operand.vmem [shape: f32[4,16,128], index: 0, kind: input, shape index: {}]   ;;  %s2037_s1 = inlined_call_operand.hbm [shape: f32[4,16,128], index: 1, kind: input, shape index: {}]   ;;  %s2038_s2 = inlined_call_operand.hbm [shape: f32[4,16,128], index: 2, kind: input, shape index: {}]   ;;  %s2039_s3 = inlined_call_operand.vmem [shape: f32[64,48], index: 3, kind: input, shape index: {}]   ;;  %s2040_s4 = inlined_call_operand.vmem [shape: f32[3,16], index: 4, kind: input, shape index: {}]   ;;  %s2041_s5 = inlined_call_operand.hbm [shape: f32[4,16,128], index: 5, kind: output, shape index: {}]  }
   0x1   :  { %12 = vsyncpa [#allocation3 + $0x1], 0 }
   0x2   :  { %13 = vsyncpa [#allocation6], 0 }
   0x3   :  { %15 = vsyncpa [#allocation6 + $0x1], 0 }
   0x4   :  { %16 = vsyncpa [#allocation4], 0 }
   0x5   :  { %18 = vsyncpa [#allocation4 + $0x1], 0  ;;  %s1585_s18 = smov 0   ;;  %s1587_s19 = smov 0  }
   0x6   :  { %s1589_s20 = smov 0   ;;  %s1591_s21 = smov 0  }
   0x7 LB: > { %s1606_s22 = sadd.s32 4294967295, %s1538_s21   ;;  %s1064_s23 = sadd.s32 4294967294, %s1538_s21   ;;  %s1538_s21 = sphi %s1591_s21, %s2058_s21   ;;  %s1534_s20 = sphi %s1589_s20, %s2057_s20   ;;  %s1530_s19 = sphi %s1587_s19, %s2056_s19   ;;  %s1526_s18 = sphi %s1585_s18, %s2055_s18  }
   0x8   : > { %s1610_s24 = sadd.s32 1, %s1538_s21   ;;  %s57_s25 = sadd.s32 1, %s1534_s20 }
   0x9   : > { %s54_s26 = ssub.s32 %s1538_s21, %s1610_s24  ;;  %p64_p0 = scmp.ne.s32.totalorder %s1534_s20, %s1530_s19 }
   0xa   : > { %p55_p1 = scmp.eq.s32.totalorder %s54_s26, 0  ;;  %p65_p2 = scmp.eq.s32.totalorder %s1538_s21, 0 }
   0xb   : > { %p70_p3 = scmp.ne.s32.totalorder %s1530_s19, %s1526_s18  ;;  %p71_p4 = scmp.eq.s32.totalorder %s1606_s22, 0 }
   0xc   : > { %s1622_s27 = scalar_select %p55_p1, %s1534_s20, %s57_s25  }
   0xd   : > { %p1624_p5 = por %p65_p2, %p64_p0  ;;  %p1628_p6 = por %p71_p4, %p70_p3 }
   0xe   : > { %p162_p7 = scmp.eq.s32.totalorder %s1606_s22, 3  ;;  %p168_p8 = scmp.eq.s32.totalorder %s1064_s23, 3 }
   0xf   : > { %s2046_s29 = scalar_select %p1628_p6, 1, 0 }
  0x10   : > { %p1346_p9 = scmp.lt.s32.totalorder %s1538_s21, 4  ;;  %p1634_p10 = por %p162_p7, %p64_p0 }
  0x11   : > { %p1638_p11 = por %p168_p8, %p70_p3  ;;  %s1643_s7 = sand.u32 1, %s1534_s20  }
  0x12   : > { %s2047_s30 = scalar_select %p1634_p10, 1, 0 }
  0x13   : > { %s2048_s6 = scalar_select %p1638_p11, 1, 0 }
  0x14   : > { %s1085_s8 = sshll.u32 %s1538_s21, 8  ;;  %s1067_s9 = sshll.u32 %s1643_s7, 4 }
  0x15   : > { %s1652_s12 = scalar_lea.hbm %s2037_s1, %s1085_s8  ;;  %s206_s13 = scalar_lea.vmem [#allocation2], %s1067_s9 }
  0x16   : > { %s213_s14 = sshll.u32 %s206_s13, 4  ;;  %p1658_p12 = pnand %p1346_p9, %p1624_p5  ;;  %s1662_s14 = int_to_ptr.vmem [resolvable:$true] %s213_s14 }
  0x17   : > { %s203_s16 = scalar_lea.sflag [#allocation3], %s1643_s7  ;;  %s1414_s17 = scalar_lea.hbm %s1652_s12, 256 }
  0x18   : > { %p1415_p13 = scmp.ne.s32.totalorder %s1652_s12, %s1414_s17  ;;  %p1416_p0 = pneg %p1658_p12 }
  0x19   : > { %s1419_s26 = scalar_lea.hbm %s2037_s1, 1024  ;;  %p1420_p3 = scmp.lt.s32.totalorder %s1652_s12, %s2037_s1 }
  0x1a   : > { %p1417_p1 = pnand %p1416_p0, %p1415_p13  ;;  %p1421_p4 = scmp.lt.s32.totalorder %s1419_s26, %s1414_s17 }
  0x1c   : > { %p1418_p2 = pneg %p1417_p1  ;;  %p1422_p5 = por %p1421_p4, %p1420_p3 }
  0x1e   : > { %p1423_p7 = pnand %p1422_p5, %p1418_p2 }
  0x20   : > { %1426 = shalt.err (!%p1423_p7)
}
  0x21   : > { %s1427_s11 = scalar_lea.vmem %s1662_s14, 256  ;;  %s1540_s13 = smov [#allocation2]  }
  0x22   : > { %p1428_p8 = scmp.ne.s32.totalorder %s1662_s14, %s1427_s11  ;;  %s1432_s23 = sshll.u32 %s1540_s13, 4  ;;  %s1433_s23 = int_to_ptr.vmem [resolvable:$false] %s1432_s23 }
  0x23   : > { %s1434_s25 = scalar_lea.vmem %s1433_s23, 512  ;;  %p1435_p1 = scmp.lt.s32.totalorder %s1662_s14, %s1433_s23 }
  0x24   : > { %p1430_p9 = pnand %p1428_p8, %p1416_p0  ;;  %p1436_p11 = scmp.lt.s32.totalorder %s1434_s25, %s1427_s11 }
  0x26   : > { %p1431_p13 = pneg %p1430_p9  ;;  %p1437_p10 = por %p1436_p11, %p1435_p1 }
  0x28   : > { %p1438_p3 = pnand %p1437_p10, %p1431_p13 }
  0x2a   : > { %1441 = shalt.err (!%p1438_p3)
}
  0x2b   : > { %s2043_s17 = smov 128   ;;  %s1542_s26 = smov 8  }
  0x2c   : > { %1338 = dma.hbm_to_vmem [thread:$0]  (!%p1658_p12), %s1652_s12, 256, %s1662_s14, %s203_s16, %s2043_s17, %s2043_s17, %s1542_s26  }
  0x2d   : > { %p1073_p10 = scmp.ge.s32.totalorder %s1538_s21, 1  ;;  %p242_p11 = scmp.lt.s32.totalorder %s1538_s21, 5 }
  0x2e   : > { %s1705_s13 = scalar_lea.hbm %s2038_s2, %s1085_s8  ;;  %s227_s23 = scalar_lea.vmem [#allocation5], %s1067_s9 }
  0x2f   : > { %p1696_p2 = pnand %p1073_p10, %p242_p11  ;;  %s234_s25 = sshll.u32 %s227_s23, 4  ;;  %s1709_s25 = int_to_ptr.vmem [resolvable:$true] %s234_s25 }
  0x30   : > { %s224_s12 = scalar_lea.sflag [#allocation6], %s1643_s7  ;;  %s1442_s14 = scalar_lea.hbm %s1705_s13, 256 }
  0x31   : > { %p1443_p4 = scmp.ne.s32.totalorder %s1705_s13, %s1442_s14  ;;  %s1447_s8 = scalar_lea.hbm %s2038_s2, 1024 }
  0x32   : > { %p1448_p8 = scmp.lt.s32.totalorder %s1705_s13, %s2038_s2  ;;  %p1449_p9 = scmp.lt.s32.totalorder %s1447_s8, %s1442_s14 }
  0x33   : > { %p1445_p5 = pnand %p1443_p4, %p1416_p0 }
  0x34   : > { %p1450_p13 = por %p1449_p9, %p1448_p8 }
  0x35   : > { %p1446_p7 = pneg %p1445_p5 }
  0x37   : > { %p1451_p1 = pnand %p1450_p13, %p1446_p7 }
  0x39   : > { %1454 = shalt.err (!%p1451_p1)
}
  0x3a   : > { %s1455_s7 = scalar_lea.vmem %s1709_s25, 256  ;;  %s1543_s9 = smov [#allocation5]  }
  0x3b   : > { %p1456_p3 = scmp.ne.s32.totalorder %s1709_s25, %s1455_s7  ;;  %s1460_s17 = sshll.u32 %s1543_s9, 4  ;;  %s1461_s17 = int_to_ptr.vmem [resolvable:$false] %s1460_s17 }
  0x3c   : > { %s1462_s23 = scalar_lea.vmem %s1461_s17, 512  ;;  %p1463_p4 = scmp.lt.s32.totalorder %s1709_s25, %s1461_s17 }
  0x3d   : > { %p1458_p10 = pnand %p1456_p3, %p1416_p0  ;;  %p1464_p5 = scmp.lt.s32.totalorder %s1462_s23, %s1455_s7 }
  0x3f   : > { %p1459_p11 = pneg %p1458_p10  ;;  %p1465_p6 = por %p1464_p5, %p1463_p4 }
  0x41   : > { %p1466_p8 = pnand %p1465_p6, %p1459_p11 }
  0x43   : > { %1469 = shalt.err (!%p1466_p8)
}
  0x44   : > { %s2051_s14 = smov 128   ;;  %246 = sbr.rel (%p1696_p2) target bundleno = 1644 (0x66c), region = 40 }
  0x45   : > { %1341 = dma.hbm_to_vmem [thread:$0]  (!%p1658_p12), %s1705_s13, 256, %s1709_s25, %s224_s12, %s2051_s14, %s2051_s14, %s1542_s26  }
  0x46   : > { %s1740_s16 = sand.u32 (!%p1696_p2), 1, %s1530_s19   ;;  %p2052_p6 = scmp.ne.s32.totalorder (!%p1696_p2), %s2046_s29, 0 }
  0x47   : > { %s1743_s8 = sshll.u32 (!%p1696_p2), %s1740_s16, 4  ;;  %s249_s10 = scalar_lea.sflag (!%p1696_p2), [#allocation3], %s1740_s16 }
  0x48   : > { %s252_s15 = scalar_lea.vmem (!%p1696_p2), [#allocation2], %s1743_s8 }
  0x49   : > { %1513 = dma.done.wait (%p2052_p6), %s249_s10, 256  }
  0x4a   : > { %1515 = vsyncadd (%p2052_p6), %s249_s10, 4294967040  ;;  %s258_s26 = scalar_lea.sflag [#allocation6], %s1740_s16  ;;  %s261_s28 = scalar_lea.vmem [#allocation5], %s1743_s8 }
  0x4b   : > { %1517 = dma.done.wait (%p2052_p6), %s258_s26, 256  }
  0x4c   : > { %1519 = vsyncadd (%p2052_p6), %s258_s26, 4294967040  ;;  %p298_p12 = scmp.lt.s32.totalorder %s1606_s22, 3  ;;  %v1544_v0 = vmov 1.0   ;;  %v1782_v2 = vld [vmem:[%s252_s15] sm:$0xff]  ;;  %v1828_v7 = vld [vmem:[%s252_s15 + $0x8] sm:$0xff]  ;;  %v1545_v11 = vmov 0  }
  0x4d   : > { %1170 = vmatprep.subr.mxu0 %v1544_v0  ;;  %1205 = vmatprep.subr.mxu1 %v1544_v0  ;;  %v1790_v4 = vld [vmem:[%s261_s28] sm:$0xff]  ;;  %v1842_v9 = vld [vmem:[%s261_s28 + $0x8] sm:$0xff]  ;;  %v1546_v49 = vmov 0.0   ;;  %vm1547_vm4 = vmmov 0   ;;  %s1548_s14 = smov 32   ;;  %s1549_s10 = smov 16  }
  0x4e   : > { %1171 = vmatpush3.msra.mxu0 %v1544_v0  ;;  %s299_s13 = scalar_select %p298_p12, %s1606_s22, 3  ;;  %1206 = vmatpush3.msra.mxu1 %v1544_v0  ;;  %v759_v46 = vld [vmem:[%s2039_s3 + $0x38] sm:$0xff]  ;;  %v758_v50 = vld [vmem:[%s2039_s3 + $0x30] sm:$0xff]  ;;  %v757_v51 = vld [vmem:[%s2039_s3 + $0x28] sm:$0xff]  ;;  %vm701_vm5 = vcmask 261312   ;;  %vm722_vm6 = vcmask 392512  }
  0x4f   : > { %1172 = vmatprep.subr.mxu0 %v1544_v0  ;;  %1207 = vmatprep.subr.mxu1 %v1544_v0  ;;  %v756_v56 = vld [vmem:[%s2039_s3 + $0x20] sm:$0xff]  ;;  %v755_v63 = vld [vmem:[%s2039_s3 + $0x18] sm:$0xff]  ;;  %vm680_vm7 = vcmask 130112   ;;  %vm746_vm8 = vcmask 130048   ;;  %vm748_vm9 = vcmask 261120   ;;  %vm743_vm10 = vcmask 523712  }
  0x50   : > { %1173 = vmatpush3.msra.mxu0 %v1544_v0  ;;  %s1087_s29 = sshll.u32 %s299_s13, 4  ;;  %1208 = vmatpush3.msra.mxu1 %v1544_v0  ;;  %vm750_vm11 = vcmask 392192   ;;  %vm760_vm12 = vcmask 523264   ;;  %s1550_s15 = smov 96  }
  0x51   : > { %1174 = vmatprep.subr.mxu0 %v1544_v0  ;;  %s1771_s11 = scalar_lea.vmem %s2036_s0, %s1087_s29  ;;  %1209 = vmatprep.subr.mxu1 %v1544_v0  ;;  %s1551_s26 = smov 112  }
  0x52   : > { %1175 = vmatpush3.msra.mxu0 %v1544_v0  ;;  %1210 = vmatpush3.msra.mxu1 %v1544_v0  ;;  %v1778_v1 = vld [vmem:[%s1771_s11] sm:$0xff]  ;;  %v1824_v6 = vld [vmem:[%s1771_s11 + $0x8] sm:$0xff]  ;;  %s297_s28 = scalar_lea.vmem [#allocation7], %s1743_s8  ;;  %s1088_s29 = sshll.u32 %s1606_s22, 8 }
  0x53   : > { %1176 = vmatprep.subr.mxu0 %v1544_v0  ;;  %1211 = vmatprep.subr.mxu1 %v1544_v0  ;;  %v307_v3 = vadd.f32 %v1782_v2, %v1778_v1  ;;  %v308_v8 = vadd.f32 %v1828_v7, %v1824_v6  ;;  %s956_s13 = sshll.u32 %s297_s28, 4  ;;  %s1994_s12 = scalar_lea.hbm %s2041_s5, %s1088_s29  ;;  %s1987_s13 = int_to_ptr.vmem [resolvable:$true] %s956_s13 }
  0x54   : > { %1177 = vmatpush3.msra.mxu0 %v1544_v0  ;;  %1212 = vmatpush3.msra.mxu1 %v1544_v0  ;;  %s943_s22 = scalar_lea.sflag [#allocation4], %s1740_s16  ;;  %s1470_s11 = scalar_lea.vmem %s1987_s13, 256 }
  0x55   : > { %1178 = vmatprep.subr.mxu0 %v1544_v0  ;;  %1213 = vmatprep.subr.mxu1 %v1544_v0  ;;  %v1797_v5 = vadd.f32 %v1790_v4, %v307_v3  ;;  %v312_v10 = vadd.f32 %v1842_v9, %v308_v8  ;;  %v754_v8 = vld [vmem:[%s2039_s3 + $0x10] sm:$0xff]  ;;  %p1471_p0 = scmp.ne.s32.totalorder %s1987_s13, %s1470_s11  ;;  %p2053_p2 = scmp.ne.s32.totalorder %s2047_s30, 0 }
  0x56   : > { %1179 = vmatpush3.msra.mxu0 %v1544_v0  ;;  %1214 = vmatpush3.msra.mxu1 %v1544_v0  ;;  %s1552_s7 = smov [#allocation7]  }
  0x57   : > { %1180 = vmatprep.subr.mxu0 %v1544_v0  ;;  %1215 = vmatprep.subr.mxu1 %v1544_v0  ;;  %p1472_p7 = pnand %p1471_p0, %p2053_p2  ;;  %s1474_s9 = sshll.u32 %s1552_s7, 4  ;;  %s1475_s9 = int_to_ptr.vmem [resolvable:$false] %s1474_s9 }
  0x58   : > { %1181 = vmatpush3.msra.mxu0 %v1544_v0  ;;  %1202 = vmatprep.mubr.f32.mxu0 %v1797_v5  ;;  %s1476_s17 = scalar_lea.vmem %s1475_s9, 512  ;;  %p1477_p13 = scmp.lt.s32.totalorder %s1987_s13, %s1475_s9 }
  0x59   : > { %1182 = vmatprep.subr.mxu0 %v1544_v0  ;;  %1216 = vmatpush3.msra.mxu1 %v1544_v0  ;;  %p1473_p9 = pneg %p1472_p7  ;;  %p1478_p1 = scmp.lt.s32.totalorder %s1476_s17, %s1470_s11 }
  0x5a   : > { %1183 = vmatpush3.msra.mxu0 %v1544_v0  ;;  %1217 = vmatprep.subr.mxu1 %v1544_v0 }
  0x5b   : > { %1184 = vmatprep.subr.mxu0 %v1544_v0  ;;  %1218 = vmatpush3.msra.mxu1 %v1544_v0  ;;  %p1479_p3 = por %p1478_p1, %p1477_p13 }
  0x5c   : > { %1185 = vmatpush3.msra.mxu0 %v1544_v0  ;;  %1219 = vmatprep.subr.mxu1 %v1544_v0 }
  0x5d   : > { %1186 = vmatprep.subr.mxu0 %v1544_v0  ;;  %1220 = vmatpush3.msra.mxu1 %v1544_v0  ;;  %p1480_p10 = pnand %p1479_p3, %p1473_p9 }
  0x5e   : > { %1187 = vmatpush3.msra.mxu0 %v1544_v0  ;;  %1221 = vmatprep.subr.mxu1 %v1544_v0 }
  0x5f   : > { %1188 = vmatprep.subr.mxu0 %v1544_v0  ;;  %1222 = vmatpush3.msra.mxu1 %v1544_v0 }
  0x60   : > { %1189 = vmatpush3.msra.mxu0 %v1544_v0  ;;  %1223 = vmatprep.subr.mxu1 %v1544_v0 }
  0x61   : > { %1190 = vmatprep.subr.mxu0 %v1544_v0  ;;  %1224 = vmatpush3.msra.mxu1 %v1544_v0 }
  0x62   : > { %1191 = vmatpush3.msra.mxu0 %v1544_v0  ;;  %1225 = vmatprep.subr.mxu1 %v1544_v0 }
  0x63   : > { %1192 = vmatprep.subr.mxu0 %v1544_v0  ;;  %1226 = vmatpush3.msra.mxu1 %v1544_v0 }
  0x64   : > { %1193 = vmatpush3.msra.mxu0 %v1544_v0  ;;  %1227 = vmatprep.subr.mxu1 %v1544_v0 }
  0x65   : > { %1194 = vmatprep.subr.mxu0 %v1544_v0  ;;  %1228 = vmatpush3.msra.mxu1 %v1544_v0 }
  0x66   : > { %1195 = vmatpush3.msra.mxu0 %v1544_v0  ;;  %1229 = vmatprep.subr.mxu1 %v1544_v0 }
  0x67   : > { %1196 = vmatprep.subr.mxu0 %v1544_v0  ;;  %1230 = vmatpush3.msra.mxu1 %v1544_v0 }
  0x68   : > { %1197 = vmatpush3.msra.mxu0 %v1544_v0  ;;  %1231 = vmatprep.subr.mxu1 %v1544_v0 }
  0x69   : > { %1198 = vmatprep.subr.mxu0 %v1544_v0  ;;  %1232 = vmatpush3.msra.mxu1 %v1544_v0 }
  0x6a   : > { %1199 = vmatpush3.msra.mxu0 %v1544_v0  ;;  %1233 = vmatprep.subr.mxu1 %v1544_v0 }
  0x6b   : > { %1200 = vmatprep.subr.mxu0 %v1544_v0  ;;  %1234 = vmatpush3.msra.mxu1 %v1544_v0 }
  0x6c   : > { %1201 = vmatpush3.msra.mxu0 %v1544_v0  ;;  %1235 = vmatprep.subr.mxu1 %v1544_v0 }
  0x6d   : > { %1203 = vmatmul.mubr.f32.vlgmr.msra.gmra.mxu0 %v312_v10  ;;  %1240 = vmatprep.subr.mxu0 %v1544_v0 }
  0x6e   : > { %1241 = vmatpush3.msra.mxu0 %v1544_v0  ;;  %1236 = vmatpush3.msra.mxu1 %v1544_v0 }
  0x6f   : > { %1242 = vmatprep.subr.mxu0 %v1544_v0  ;;  %1275 = vmatprep.subr.mxu1 %v1544_v0 }
  0x70   : > { %1243 = vmatpush3.msra.mxu0 %v1544_v0  ;;  %1392 = vset.pattern.permute.xlu0 %v1545_v11 }
  0x71   : > { %1244 = vmatprep.subr.mxu0 %v1544_v0  ;;  %1393 = vset.pattern.permute.xlu1 %v1545_v11 }
  0x72   : > { %1245 = vmatpush3.msra.mxu0 %v1544_v0 }
  0x73   : > { %1246 = vmatprep.subr.mxu0 %v1544_v0 }
  0x74   : > { %1247 = vmatpush3.msra.mxu0 %v1544_v0 }
  0x75   : > { %1248 = vmatprep.subr.mxu0 %v1544_v0 }
  0x76   : > { %1249 = vmatpush3.msra.mxu0 %v1544_v0 }
  0x77   : > { %1250 = vmatprep.subr.mxu0 %v1544_v0 }
  0x78   : > { %1251 = vmatpush3.msra.mxu0 %v1544_v0 }
  0x79   : > { %1252 = vmatprep.subr.mxu0 %v1544_v0 }
  0x7a   : > { %1253 = vmatpush3.msra.mxu0 %v1544_v0 }
  0x7b   : > { %1254 = vmatprep.subr.mxu0 %v1544_v0 }
  0x7c   : > { %1255 = vmatpush3.msra.mxu0 %v1544_v0 }
  0x7d   : > { %1256 = vmatprep.subr.mxu0 %v1544_v0 }
  0x7e   : > { %1257 = vmatpush3.msra.mxu0 %v1544_v0 }
  0x7f   : > { %1258 = vmatprep.subr.mxu0 %v1544_v0 }
  0x80   : > { %1259 = vmatpush3.msra.mxu0 %v1544_v0 }
  0x81   : > { %1260 = vmatprep.subr.mxu0 %v1544_v0 }
  0x82   : > { %1261 = vmatpush3.msra.mxu0 %v1544_v0 }
  0x83   : > { %1262 = vmatprep.subr.mxu0 %v1544_v0 }
  0x84   : > { %1263 = vmatpush3.msra.mxu0 %v1544_v0 }
  0x85   : > { %1264 = vmatprep.subr.mxu0 %v1544_v0 }
  0x86   : > { %1265 = vmatpush3.msra.mxu0 %v1544_v0 }
  0x87   : > { %1266 = vmatprep.subr.mxu0 %v1544_v0 }
  0x88   : > { %1267 = vmatpush3.msra.mxu0 %v1544_v0 }
  0x89   : > { %1268 = vmatprep.subr.mxu0 %v1544_v0 }
  0x8a   : > { %1269 = vmatpush3.msra.mxu0 %v1544_v0 }
  0x8b   : > { %1270 = vmatprep.subr.mxu0 %v1544_v0 }
  0x8c   : > { %1271 = vmatpush3.msra.mxu0 %v1544_v0 }
  0x8d   : > { %1310 = vmatprep.subr.mxu0 %v1546_v49 }
 0x12d   : > { %v1204_v12 = vpop.f32.mrf.mxu0 }
 0x12e   : > { %v389_v15 = vmul.f32 0.0078125, %v1204_v12  ;;  %v753_v12 = vld [vmem:[%s2039_s3 + $0x8] sm:$0xff] }
 0x12f   : > { %v379_v13 = vpop.f32.mrf.mxu0 }
 0x130   : > { %v388_v14 = vmul.f32 0.0078125, %v379_v13 }
 0x132   : > { %392 = vperm.xlu0 %1392, %v388_v14   ;;  %v752_v14 = vld [vmem:[%s2039_s3] sm:$0xff] }
 0x136   : > { %397 = vperm.xlu0 %1392, %v389_v15   ;;  %v1957_v15 = vld [vmem:[%s2040_s4] sm:$0x7] }
 0x1ad   : > { %v1892_v16 = vpop.permute.xlu0 %392 }
 0x1ae   : > { %v400_v17 = vsub.f32 %v1797_v5, %v1892_v16 }
 0x1b0   : > { %v402_v18 = vmul.f32 %v400_v17, %v400_v17 }
 0x1b1   : > { %v1896_v19 = vpop.permute.xlu0 %397 }
 0x1b2   : > { %v481_v20 = vmul.f32 %v402_v18, %v400_v17  ;;  %v401_v21 = vsub.f32 %v312_v10, %v1896_v19  ;;  %1237 = vmatprep.mubr.f32.mxu1 %v402_v18  ;;  %v560_v23 = vmul.f32 %v402_v18, %v402_v18  ;;  %v842_v17 = vrot.slane %v1957_v15, 2 }
 0x1b3   : > { %v837_v18 = vrot.slane %v1957_v15, 1 }
 0x1b4   : > { %v403_v22 = vmul.f32 %v401_v21, %v401_v21  ;;  %1272 = vmatprep.mubr.f32.mxu0 %v481_v20  ;;  %v669_v20 = vlaneseq }
 0x1b6   : > { %v482_v24 = vmul.f32 %v403_v22, %v401_v21  ;;  %1238 = vmatmul.mubr.f32.vlgmr.msra.gmra.mxu1 %v403_v22  ;;  %v561_v25 = vmul.f32 %v403_v22, %v403_v22  ;;  %v670_v22 = vand.u32 127, %v669_v20 }
 0x1b7   : > { %1276 = vmatpush3.msra.mxu1 %v1544_v0  ;;  %1307 = vmatprep.mubr.f32.mxu1 %v560_v23 }
 0x1b8   : > { %1277 = vmatprep.subr.mxu1 %v1544_v0  ;;  %1273 = vmatmul.mubr.f32.vlgmr.msra.gmra.mxu0 %v482_v24  ;;  %v691_v23 = vadd.s32 4294967280, %v670_v22  ;;  %v675_v24 = vadd.s32 4294967288, %v670_v22 }
 0x1b9   : > { %1278 = vmatpush3.msra.mxu1 %v1544_v0  ;;  %1311 = vmatpush3.msra.mxu0 %v759_v46 }
 0x1ba   : > { %1279 = vmatprep.subr.mxu1 %v1544_v0  ;;  %1312 = vmatprep.subr.mxu0 %v1546_v49 }
 0x1bb   : > { %1280 = vmatpush3.msra.mxu1 %v1544_v0  ;;  %1313 = vmatpush3.msra.mxu0 %v758_v50 }
 0x1bc   : > { %1281 = vmatprep.subr.mxu1 %v1544_v0  ;;  %1314 = vmatprep.subr.mxu0 %v1546_v49 }
 0x1bd   : > { %1282 = vmatpush3.msra.mxu1 %v1544_v0  ;;  %1315 = vmatpush3.msra.mxu0 %v757_v51 }
 0x1be   : > { %1283 = vmatprep.subr.mxu1 %v1544_v0  ;;  %1316 = vmatprep.subr.mxu0 %v1546_v49 }
 0x1bf   : > { %1284 = vmatpush3.msra.mxu1 %v1544_v0  ;;  %1317 = vmatpush3.msra.mxu0 %v756_v56 }
 0x1c0   : > { %1285 = vmatprep.subr.mxu1 %v1544_v0  ;;  %1318 = vmatprep.subr.mxu0 %v1546_v49 }
 0x1c1   : > { %1286 = vmatpush3.msra.mxu1 %v1544_v0  ;;  %1319 = vmatpush3.msra.mxu0 %v755_v63 }
 0x1c2   : > { %1287 = vmatprep.subr.mxu1 %v1544_v0  ;;  %1320 = vmatprep.subr.mxu0 %v1546_v49 }
 0x1c3   : > { %1288 = vmatpush3.msra.mxu1 %v1544_v0  ;;  %1321 = vmatpush3.msra.mxu0 %v754_v8 }
 0x1c4   : > { %1289 = vmatprep.subr.mxu1 %v1544_v0  ;;  %1322 = vmatprep.subr.mxu0 %v1546_v49 }
 0x1c5   : > { %1290 = vmatpush3.msra.mxu1 %v1544_v0  ;;  %1323 = vmatpush3.msra.mxu0 %v753_v12 }
 0x1c6   : > { %1291 = vmatprep.subr.mxu1 %v1544_v0  ;;  %1324 = vmatprep.subr.mxu0 %v1546_v49 }
 0x1c7   : > { %1292 = vmatpush3.msra.mxu1 %v1544_v0  ;;  %1326 = vmatprep.mubr.msk.f32.mxu0 %vm1547_vm4, %v1546_v49 }
 0x1c8   : > { %1293 = vmatprep.subr.mxu1 %v1544_v0  ;;  %1325 = vmatpush3.msra.mxu0 %v752_v14 }
 0x1c9   : > { %1294 = vmatpush3.msra.mxu1 %v1544_v0 }
 0x1ca   : > { %1295 = vmatprep.subr.mxu1 %v1544_v0 }
 0x1cb   : > { %1296 = vmatpush3.msra.mxu1 %v1544_v0 }
 0x1cc   : > { %1297 = vmatprep.subr.mxu1 %v1544_v0 }
 0x1cd   : > { %1298 = vmatpush3.msra.mxu1 %v1544_v0 }
 0x1ce   : > { %1299 = vmatprep.subr.mxu1 %v1544_v0 }
 0x1cf   : > { %1300 = vmatpush3.msra.mxu1 %v1544_v0 }
 0x1d0   : > { %1301 = vmatprep.subr.mxu1 %v1544_v0 }
 0x1d1   : > { %1302 = vmatpush3.msra.mxu1 %v1544_v0 }
 0x1d2   : > { %1303 = vmatprep.subr.mxu1 %v1544_v0 }
 0x1d3   : > { %1304 = vmatpush3.msra.mxu1 %v1544_v0 }
 0x1d4   : > { %1305 = vmatprep.subr.mxu1 %v1544_v0 }
 0x1d5   : > { %1306 = vmatpush3.msra.mxu1 %v1544_v0 }
 0x1d6   : > { %1308 = vmatmul.mubr.f32.vlgmr.msra.gmra.mxu1 %v561_v25  ;;  %v1963_v25 = vshrl.u32 %v669_v20, 7 }
 0x276   : > { %v1239_v26 = vpop.f32.mrf.mxu1 }
 0x277   : > { %v480_v27 = vmul.f32 0.0078125, %v1239_v26  ;;  %v696_v26 = vadd.s32 4294967272, %v670_v22 }
 0x278   : > { %v470_v28 = vpop.f32.mrf.mxu1  ;;  %v1274_v52 = vpop.f32.mrf.mxu0 }
 0x279   : > { %v640_v29 = vadd.f32 1e-08, %v480_v27  ;;  %v479_v30 = vmul.f32 0.0078125, %v470_v28  ;;  %v559_v55 = vmul.f32 0.0078125, %v1274_v52  ;;  %v712_v27 = vadd.s32 4294967264, %v670_v22 }
 0x27a   : > { %v549_v53 = vpop.f32.mrf.mxu0 }
 0x27b   : > { %1394 = vrsqrt.f32 %v640_v29  ;;  %v639_v31 = vadd.f32 1e-08, %v479_v30  ;;  %vm650_vm0 = vcmp.eq.f32.partialorder %v640_v29, inf  ;;  %v653_v35 = vand.u32 2147483648, %v640_v29 }
 0x27c   : > { %vm652_vm1 = vcmp.eq.f32.partialorder %v640_v29, 0.0  ;;  %v558_v59 = vmul.f32 0.0078125, %v549_v53  ;;  %v694_v30 = vsub.s32 %v691_v23, %v1963_v25 }
 0x27d   : > { %1396 = vrsqrt.f32 %v639_v31  ;;  %vm643_vm2 = vcmp.eq.f32.partialorder %v639_v31, inf  ;;  %v646_v39 = vand.u32 2147483648, %v639_v31  ;;  %vm645_vm3 = vcmp.eq.f32.partialorder %v639_v31, 0.0 }
 0x288   : > { %v1395_v32 = vpop.eup %1394 }
 0x289   : > { %v649_v33 = vmul.f32 %v1395_v32, %v640_v29  ;;  %v699_v32 = vsub.s32 %v696_v26, %v1963_v25 }
 0x28a   : > { %v1397_v34 = vpop.eup %1396 }
 0x28b   : > { %v651_v36 = vsel %vm650_vm0, %v640_v29, %v649_v33  ;;  %v642_v37 = vmul.f32 %v1397_v34, %v639_v31  ;;  %v717_v29 = vadd.s32 4294967256, %v670_v22  ;;  %v715_v33 = vsub.s32 %v712_v27, %v1963_v25 }
 0x28c   : > { %v654_v38 = vsel %vm652_vm1, %v653_v35, %v651_v36  ;;  %v738_v34 = vadd.s32 4294967240, %v670_v22  ;;  %v733_v35 = vadd.s32 4294967248, %v670_v22 }
 0x28d   : > { %689 = vperm.xlu1 %1393, %v654_v38   ;;  %v656_v40 = vmul.f32 %v654_v38, %v654_v38  ;;  %v644_v41 = vsel %vm643_vm2, %v639_v31, %v642_v37  ;;  %v678_v31 = vsub.s32 %v675_v24, %v1963_v25  ;;  %v720_v36 = vsub.s32 %v717_v29, %v1963_v25 }
 0x28e   : > { %v647_v42 = vsel %vm645_vm3, %v646_v39, %v644_v41 }
 0x28f   : > { %v658_v43 = vmul.f32 %v656_v40, %v654_v38  ;;  %v664_v44 = vmul.f32 %v656_v40, %v656_v40  ;;  %v655_v45 = vmul.f32 %v647_v42, %v647_v42  ;;  %v673_v38 = vsub.s32 %v670_v22, %v1963_v25 }
 0x290   : > { %v679_v40 = vrot.slane %v1896_v19, %v678_v31 }
 0x291   : > { %1398 = vrcp.f32 %v658_v43  ;;  %686 = vperm.xlu1 %1393, %v647_v42   ;;  %v657_v47 = vmul.f32 %v655_v45, %v647_v42  ;;  %v663_v48 = vmul.f32 %v655_v45, %v655_v45  ;;  %v736_v45 = vsub.s32 %v733_v35, %v1963_v25 }
 0x292   : > { %1400 = vrcp.f32 %v664_v44  ;;  %v741_v44 = vsub.s32 %v738_v34, %v1963_v25 }
 0x293   : > { %1402 = vrcp.f32 %v657_v47 }
 0x294   : > { %1404 = vrcp.f32 %v663_v48  ;;  %v674_v48 = vrot.slane %v1892_v16, %v673_v38 }
 0x296   : > { %v1309_v54 = vpop.f32.mrf.mxu1  ;;  %v681_v51 = vsel %vm680_vm7, %v679_v40, %v674_v48 }
 0x297   : > { %v638_v0 = vmul.f32 0.0078125, %v1309_v54 }
 0x298   : > { %v628_v62 = vpop.f32.mrf.mxu1 }
 0x299   : > { %v637_v11 = vmul.f32 0.0078125, %v628_v62 }
 0x29e   : > { %v1399_v57 = vpop.eup %1398 }
 0x29f   : > { %v1401_v58 = vpop.eup %1400  ;;  %v662_v60 = vmul.f32 %v1399_v57, %v559_v55 }
 0x2a0   : > { %v1403_v61 = vpop.eup %1402  ;;  %v668_v10 = vmul.f32 %v1401_v58, %v638_v0 }
 0x2a1   : > { %710 = vperm.xlu1 %1393, %v662_v60   ;;  %v660_v3 = vmul.f32 %v1403_v61, %v558_v59  ;;  %v1405_v5 = vpop.eup %1404 }
 0x2a2   : > { %v666_v13 = vmul.f32 %v1405_v5, %v637_v11 }
 0x2a3   : > { %707 = vperm.xlu0 %1392, %v660_v3  }
 0x2a5   : > { %731 = vperm.xlu1 %1393, %v668_v10  }
 0x2a7   : > { %728 = vperm.xlu0 %1392, %v666_v13  }
 0x2a9   : > { %843 = vrot.lane.b32.xlu1 %v842_v17, %s1548_s14 }
 0x2ab   : > { %838 = vrot.lane.b32.xlu0 %v837_v18, %s1549_s10 }
 0x308   : > { %v690_v21 = vpop.permute.xlu1 %689 }
 0x309   : > { %v700_v42 = vrot.slane %v690_v21, %v699_v32 }
 0x30c   : > { %v687_v28 = vpop.permute.xlu1 %686 }
 0x30d   : > { %v695_v39 = vrot.slane %v687_v28, %v694_v30  ;;  %v888_v28 = vsub.s32 0, %v1963_v25 }
 0x30f   : > { %v702_v49 = vsel %vm701_vm5, %v700_v42, %v695_v39 }
 0x310   : > { %v747_v54 = vsel %vm746_vm8, %v681_v51, %v702_v49 }
 0x31c   : > { %v711_v37 = vpop.permute.xlu1 %710 }
 0x31d   : > { %v721_v46 = vrot.slane %v711_v37, %v720_v36 }
 0x31e   : > { %v708_v41 = vpop.permute.xlu0 %707 }
 0x31f   : > { %v716_v43 = vrot.slane %v708_v41, %v715_v33 }
 0x320   : > { %v732_v47 = vpop.permute.xlu1 %731 }
 0x321   : > { %v723_v50 = vsel %vm722_vm6, %v721_v46, %v716_v43  ;;  %v742_v52 = vrot.slane %v732_v47, %v741_v44 }
 0x322   : > { %v729_v19 = vpop.permute.xlu0 %728  ;;  %v749_v55 = vsel %vm748_vm9, %v747_v54, %v723_v50 }
 0x323   : > { %v737_v53 = vrot.slane %v729_v19, %v736_v45 }
 0x324   : > { %v844_v58 = vpop.permute.xlu1 %843 }
 0x325   : > { %v744_v56 = vsel %vm743_vm10, %v742_v52, %v737_v53 }
 0x326   : > { %v751_v57 = vsel %vm750_vm11, %v749_v55, %v744_v56  ;;  %v839_v59 = vpop.permute.xlu0 %838 }
 0x327   : > { %1327 = vmatmul.mubr.msk.f32.vlgmr.msra.gmra.mxu0 %vm760_vm12, %v751_v57 }
 0x3e7   : > { %v830_v60 = vpop.f32.mrf.mxu0 }
 0x3e8   : > { %v841_v16 = vadd.f32 %v839_v59, %v830_v60  ;;  %v846_v61 = vadd.f32 %v844_v58, %v830_v60  ;;  %v835_v63 = vadd.f32 %v1957_v15, %v830_v60 }
 0x3e9   : > { %v1328_v62 = vpop.f32.mrf.mxu0 }
 0x3ea   : > { %853 = vrot.lane.b32.xlu1 %v846_v61, %s1550_s15  ;;  %848 = vrot.lane.b32.xlu0 %v841_v16, %s1551_s26 }
 0x45c   : > { %v849_v0 = vpop.permute.xlu0 %848  ;;  %v854_v5 = vpop.permute.xlu1 %853 }
 0x45d   : > { %v851_v3 = vmax.f32 %v835_v63, %v849_v0 }
 0x45f   : > { %v856_v8 = vmax.f32 %v851_v3, %v854_v5 }
 0x461   : > { %v857_v10 = vsub.f32 %v835_v63, %v856_v8  ;;  %867 = vrot.lane.b32.xlu1 %v856_v8, %s1548_s14  ;;  %861 = vrot.lane.b32.xlu0 %v856_v8, %s1549_s10 }
 0x463   : > { %v858_v15 = vmul.f32 1.442695, %v857_v10 }
 0x4d3   : > { %v868_v11 = vpop.permute.xlu1 %867  ;;  %v862_v12 = vpop.permute.xlu0 %861 }
 0x4d4   : > { %v870_v13 = vsub.f32 %v846_v61, %v868_v11  ;;  %v864_v14 = vsub.f32 %v841_v16, %v862_v12 }
 0x4d6   : > { %v871_v17 = vmul.f32 1.442695, %v870_v13  ;;  %v865_v18 = vmul.f32 1.442695, %v864_v14 }
 0x4d8   : > { %1406 = vpow2.f32 %v871_v17 }
 0x4d9   : > { %1408 = vpow2.f32 %v865_v18 }
 0x4da   : > { %1410 = vpow2.f32 %v858_v15 }
 0x4e5   : > { %v1407_v20 = vpop.eup %1406 }
 0x4e6   : > { %v1409_v21 = vpop.eup %1408  ;;  %879 = vrot.lane.b32.xlu1 %v1407_v20, %s1550_s15 }
 0x4e7   : > { %874 = vrot.lane.b32.xlu0 %v1409_v21, %s1551_s26  ;;  %v1411_v22 = vpop.eup %1410 }
 0x558   : > { %v880_v26 = vpop.permute.xlu1 %879 }
 0x559   : > { %v875_v23 = vpop.permute.xlu0 %874 }
 0x55a   : > { %v877_v24 = vadd.f32 %v1411_v22, %v875_v23 }
 0x55c   : > { %v882_v27 = vadd.f32 %v880_v26, %v877_v24 }
 0x55e   : > { %1412 = vrcp.f32 %v882_v27 }
 0x56b   : > { %v1413_v29 = vpop.eup %1412 }
 0x56c   : > { %920 = vrot.lane.b32.xlu1 %v1413_v29, %s1548_s14  ;;  %900 = vrot.lane.b32.xlu0 %v1413_v29, %s1549_s10  ;;  %v885_v30 = vmul.f32 %v1413_v29, %v1411_v22 }
 0x56e   : > { %v889_v31 = vrot.slane %v885_v30, %v888_v28 }
 0x570   : > { %895 = vbcast.lane.b32.xlu1 %v889_v31, 264  ;;  %891 = vbcast.lane.b32.xlu0 %v889_v31, 256 }
 0x5de   : > { %v921_v32 = vpop.permute.xlu1 %920  ;;  %v901_v33 = vpop.permute.xlu0 %900 }
 0x5df   : > { %v903_v34 = vmul.f32 %v1409_v21, %v901_v33  ;;  %v923_v35 = vmul.f32 %v1407_v20, %v921_v32 }
 0x5e1   : > { %v907_v36 = vrot.slane %v903_v34, %v888_v28  ;;  %v927_v37 = vrot.slane %v923_v35, %v888_v28 }
 0x5e2   : > { %v896_v25 = vpop.permute.xlu1 %895  ;;  %v892_v38 = vpop.permute.xlu0 %891 }
 0x5e3   : > { %914 = vbcast.lane.b32.xlu1 %v907_v36, 280  ;;  %910 = vbcast.lane.b32.xlu0 %v907_v36, 272  ;;  %v898_v43 = vmul.f32 %v896_v25, %v1824_v6  ;;  %v897_v44 = vmul.f32 %v892_v38, %v1778_v1 }
 0x5e7   : > { %934 = vbcast.lane.b32.xlu1 %v927_v37, 296  ;;  %930 = vbcast.lane.b32.xlu0 %v927_v37, 288 }
 0x655   : > { %v915_v39 = vpop.permute.xlu1 %914  ;;  %v911_v40 = vpop.permute.xlu0 %910 }
 0x656   : > { %v917_v41 = vmul.f32 %v915_v39, %v1828_v7  ;;  %v916_v42 = vmul.f32 %v911_v40, %v1782_v2 }
 0x658   : > { %v919_v47 = vadd.f32 %v917_v41, %v898_v43  ;;  %v918_v48 = vadd.f32 %v916_v42, %v897_v44 }
 0x659   : > { %v935_v45 = vpop.permute.xlu1 %934  ;;  %v931_v46 = vpop.permute.xlu0 %930 }
 0x65a   : > { %v937_v7 = vmul.f32 %v935_v45, %v1842_v9  ;;  %v936_v2 = vmul.f32 %v931_v46, %v1790_v4 }
 0x65c   : > { %v939_v1 = vadd.f32 %v937_v7, %v919_v47  ;;  %v938_v6 = vadd.f32 %v936_v2, %v918_v48 }
 0x65e   : > { %941 = vst [vmem:[%s297_s28 + $0x8] sm:$0xff] %v939_v1  ;;  %940 = vst [vmem:[%s297_s28] sm:$0xff] %v938_v6 }
 0x65f   : > { %1483 = shalt.err (!%p1480_p10)
}
 0x660   : > { %s1484_s23 = scalar_lea.hbm %s1994_s12, 256  ;;  %s1488_s15 = scalar_lea.hbm %s2041_s5, 1024 }
 0x661   : > { %p1485_p11 = scmp.ne.s32.totalorder %s1994_s12, %s1484_s23  ;;  %p1489_p8 = scmp.lt.s32.totalorder %s1994_s12, %s2041_s5 }
 0x662   : > { %p1490_p6 = scmp.lt.s32.totalorder %s1488_s15, %s1484_s23 }
 0x663   : > { %p1486_p4 = pnand %p1485_p11, %p2053_p2 }
 0x664   : > { %p1491_p12 = por %p1490_p6, %p1489_p8 }
 0x665   : > { %p1487_p5 = pneg %p1486_p4 }
 0x667   : > { %p1492_p0 = pnand %p1491_p12, %p1487_p5 }
 0x669   : > { %1495 = shalt.err (!%p1492_p0)
}
 0x66a   : > { %s1553_s29 = smov 128   ;;  %s1554_s8 = smov 8  }
 0x66b   : > { %1333 = dma.vmem_to_hbm [thread:$0]  (%p2053_p2), %s1987_s13, 256, %s1994_s12, %s943_s22, %s1553_s29, %s1553_s29, %s1554_s8  }
 0x66c PF: > { %p1347_p7 = scmp.ge.s32.totalorder %s1538_s21, 2  ;;  %s971_s25 = sand.u32 1, %s1526_s18  }
 0x66d   : > { %p2054_p9 = scmp.ne.s32.totalorder %s2048_s6, 0  ;;  %s972_s11 = scalar_lea.sflag [#allocation4], %s971_s25 }
 0x66f   : > { %p1343_p13 = pnand %p1347_p7, %p2054_p9 }
 0x671   : > { %p1344_p1 = pneg %p1343_p13 }
 0x673   : > { %1521 = dma.done.wait (%p1344_p1), %s972_s11, 256  }
 0x674   : > { %1523 = vsyncadd (%p1344_p1), %s972_s11, 4294967040  ;;  %p21_p3 = scmp.ge.s32.totalorder %s1610_s24, 6   ;;  %s2055_s18 = smov %s1530_s19 }
 0x675   : > { %s2056_s19 = smov %s1534_s20  ;;  %s2057_s20 = smov %s1622_s27 }
 0x676   : > { %s2058_s21 = smov %s1610_s24  ;;  %23 = sbr.rel (!%p21_p3) target bundleno = 7 (0x7), region = 101 }
 0x67b   :  { %977 = vsyncpa [#allocation3], 1 }
 0x67c   :  { %979 = vsyncpa [#allocation3 + $0x1], 1 }
 0x67d   :  { %980 = vsyncpa [#allocation6], 1 }
 0x67e   :  { %982 = vsyncpa [#allocation6 + $0x1], 1 }
 0x67f   :  { %983 = vsyncpa [#allocation4], 1 }
 0x680   :  { %985 = vsyncpa [#allocation4 + $0x1], 1 }

</bundles_post_ra>
